<compile_context>
chip_gen: v6e
topology: v6e:2x2x1
jax: 0.10.0
libtpu: 0.0.40
codegen_flags: <defaults>
</compile_context>

<pallas_src>
import math
import functools

import jax
import jax.numpy as jnp
from jax.experimental import pallas as pl
from jax.experimental.pallas import tpu as pltpu


def _round_up(x, m):
    return ((x + m - 1) // m) * m


def bert_output_kernel(x_ref, res_ref, w_ref, b_ref, g_ref, beta_ref,
                       out_ref, *, eps):
    # Dense projection on the MXU: bf16 operands, f32 accumulation.
    h = jnp.dot(x_ref[...], w_ref[...], preferred_element_type=jnp.float32)

    # bias + dropout(identity at inference) + residual, all in f32
    y = h + b_ref[...] + res_ref[...]

    # per-token LayerNorm over the hidden dim (two-pass, centered variance)
    mu = jnp.mean(y, axis=-1, keepdims=True)
    yc = y - mu
    var = jnp.mean(yc * yc, axis=-1, keepdims=True)
    y_hat = yc * jax.lax.rsqrt(var + eps)

    # affine (gamma, beta), cast only at the final store
    out_ref[...] = (y_hat * g_ref[...] + beta_ref[...]).astype(out_ref.dtype)


@functools.partial(
    jax.jit,
    static_argnames=("eps", "tm", "out_dtype", "single_buffer_weights"))
def _bert_output_impl(hidden_states, input_tensor, w_t, b, gamma, beta, *,
                      eps, tm, out_dtype, single_buffer_weights):
    B, L, I = hidden_states.shape
    H = input_tensor.shape[-1]
    M = B * L

    # Fold batch into the matmul M dim; bf16 only for the MXU operands.
    x2 = hidden_states.reshape(M, I).astype(jnp.bfloat16)
    r2 = input_tensor.reshape(M, H).astype(jnp.float32)
    w_bf = w_t.astype(jnp.bfloat16)
    b2 = b.reshape(1, H).astype(jnp.float32)
    g2 = gamma.reshape(1, H).astype(jnp.float32)
    beta2 = beta.reshape(1, H).astype(jnp.float32)

    # M-tile: multiple of 16 (bf16 sublane packing), clamped to the problem so
    # tiny problems run as a single block.  For production M, keep tm <= M/2 so
    # the "parallel" grid axis has >=2 steps and both v7x TensorCores get work.
    tm = max(16, (tm // 16) * 16)
    tm_eff = min(tm, _round_up(M, 16))
    M_pad = _round_up(M, tm_eff)
    if M_pad != M:
        x2 = jnp.pad(x2, ((0, M_pad - M), (0, 0)))
        r2 = jnp.pad(r2, ((0, M_pad - M), (0, 0)))
    grid = (M_pad // tm_eff,)

    # Explicit VMEM budget: double-buffered activation tiles + resident
    # weight/vectors, ~30% headroom, clamped to [32 MiB, 100 MiB].
    out_itemsize = jnp.dtype(out_dtype).itemsize
    w_bufs = 1 if single_buffer_weights else 2
    vmem_needed = (
        2 * tm_eff * I * 2              # x tile, bf16, double-buffered
        + 2 * tm_eff * H * 4            # residual tile, f32, double-buffered
        + 2 * tm_eff * H * out_itemsize  # output tile, double-buffered
        + w_bufs * I * H * 2            # resident W^T, bf16
        + w_bufs * 3 * H * 4)           # bias / gamma / beta, f32
    vmem_limit = int(min(max(vmem_needed * 1.3, 32 * 1024 * 1024),
                         100 * 1024 * 1024))

    # Constant-index_map operands never change across grid steps: request
    # single-buffering so the resident W^T does not cost 2x VMEM.
    resident = (dict(pipeline_mode=pl.Buffered(1))
                if single_buffer_weights else {})

    out = pl.pallas_call(
        functools.partial(bert_output_kernel, eps=eps),
        out_shape=jax.ShapeDtypeStruct((M_pad, H), out_dtype),
        grid=grid,
        in_specs=[
            pl.BlockSpec((tm_eff, I), lambda i: (i, 0)),            # x tile
            pl.BlockSpec((tm_eff, H), lambda i: (i, 0)),            # residual
            pl.BlockSpec((I, H), lambda i: (0, 0), **resident),     # W^T
            pl.BlockSpec((1, H), lambda i: (0, 0), **resident),     # bias
            pl.BlockSpec((1, H), lambda i: (0, 0), **resident),     # gamma
            pl.BlockSpec((1, H), lambda i: (0, 0), **resident),     # beta
        ],
        # Lane-dense output when H is a multiple of 128 (unmasked vst).
        out_specs=pl.BlockSpec((tm_eff, H), lambda i: (i, 0)),
        compiler_params=pltpu.CompilerParams(
            dimension_semantics=("parallel",),      # megacore split on v7x
            vmem_limit_bytes=vmem_limit),
    )(x2, r2, w_bf, b2, g2, beta2)

    return out[:M].reshape(B, L, H)


def bert_output(hidden_states, input_tensor, w_t, b, gamma, beta, *,
                eps=1e-12, tm=512, out_dtype=jnp.float32):
    """hidden_states: (B, L, intermediate), input_tensor: (B, L, hidden),
    w_t: (intermediate, hidden) = pre-transposed nn.Linear weight."""
    kwargs = dict(eps=eps, tm=tm, out_dtype=out_dtype)
    try:
        return _bert_output_impl(hidden_states, input_tensor, w_t, b, gamma,
                                 beta, single_buffer_weights=True, **kwargs)
    except Exception:
        # pl.Buffered(1) (single-buffered resident operands) not supported by
        # this JAX/Mosaic build -> fall back to default double-buffering.
        return _bert_output_impl(hidden_states, input_tensor, w_t, b, gamma,
                                 beta, single_buffer_weights=False, **kwargs)


# ---------------- pure-JAX reference (mirrors the PyTorch forward) ----------
def bert_output_reference(hidden_states, input_tensor, w, b, gamma, beta,
                          eps=1e-12, matmul_dtype=None):
    x, wt = hidden_states, w.T
    if matmul_dtype is not None:                      # bf16-consistent variant
        x, wt = x.astype(matmul_dtype), wt.astype(matmul_dtype)
    h = jnp.dot(x, wt, preferred_element_type=jnp.float32) + b   # nn.Linear
    y = h + input_tensor                              # dropout(id) + residual
    mu = jnp.mean(y, axis=-1, keepdims=True)
    var = jnp.mean((y - mu) ** 2, axis=-1, keepdims=True)
    return gamma * ((y - mu) / jnp.sqrt(var + eps)) + beta


def init_linear(key, in_f, out_f):
    kw, kb = jax.random.split(key)
    bound = 1.0 / math.sqrt(in_f)
    w = jax.random.uniform(kw, (out_f, in_f), jnp.float32, -bound, bound)
    b = jax.random.uniform(kb, (out_f,), jnp.float32, -bound, bound)
    return w, b


if __name__ == "__main__":
    # Toy BERT config: hidden_size=128 (multiple of 128 -> lane-dense output),
    # intermediate_size=512, batch=2, seq=8.
    B, L, H, I = 2, 8, 128, 512

    key = jax.random.PRNGKey(0)
    kx, kr, kw, kg, kbeta = jax.random.split(key, 5)

    hidden_states = jax.random.normal(kx, (B, L, I), jnp.float32)
    input_tensor = jax.random.normal(kr, (B, L, H), jnp.float32)

    w, b = init_linear(kw, I, H)                      # Linear(I -> H)
    gamma = 1.0 + 0.1 * jax.random.normal(kg, (H,), jnp.float32)
    beta = 0.1 * jax.random.normal(kbeta, (H,), jnp.float32)

    # Pre-transpose the Linear weight (out,in) -> (in,out) for the kernel.
    w_t = jnp.asarray(w.T)

    out = bert_output(hidden_states, input_tensor, w_t, b, gamma, beta)
    out = jax.block_until_ready(out)

    # bf16-consistent reference (same bf16 matmul, f32 LN) -> tight tolerance;
    # full-f32 reference -> loose tolerance covering bf16 input rounding.
    ref_bf16 = bert_output_reference(hidden_states, input_tensor, w, b,
                                     gamma, beta, matmul_dtype=jnp.bfloat16)
    ref_f32 = bert_output_reference(hidden_states, input_tensor, w, b,
                                    gamma, beta)
    assert out.shape == ref_f32.shape, (out.shape, ref_f32.shape)
    err_bf16 = float(jnp.max(jnp.abs(out - ref_bf16)))
    err_f32 = float(jnp.max(jnp.abs(out - ref_f32)))
    assert jnp.allclose(out, ref_bf16, rtol=2e-3, atol=2e-3), err_bf16
    assert jnp.allclose(out, ref_f32, rtol=5e-2, atol=5e-2), err_f32

    print("KERNEL_OK")
</pallas_src>

<mosaic_0001>
module attributes {stable_mosaic.version = 11 : i64} {
  func.func @bert_output_kernel(%arg0: i32, %arg1: memref<16x512xbf16, #tpu.memory_space<vmem>>, %arg2: memref<16x128xf32, #tpu.memory_space<vmem>>, %arg3: memref<512x128xbf16, #tpu.memory_space<vmem>>, %arg4: memref<1x128xf32, #tpu.memory_space<vmem>>, %arg5: memref<1x128xf32, #tpu.memory_space<vmem>>, %arg6: memref<1x128xf32, #tpu.memory_space<vmem>>, %arg7: memref<16x128xf32, #tpu.memory_space<vmem>>) attributes {dimension_semantics = [#tpu.dimension_semantics<parallel>], iteration_bounds = array<i64: 1>, scalar_prefetch = 0 : i64, scratch_operands = 0 : i64, tpu.core_type = #tpu.core_type<tc>, window_params = [{transform_indices = @transform_0, window_bounds = array<i64: 16, 512>}, {transform_indices = @transform_1, window_bounds = array<i64: 16, 128>}, {pipeline_mode = #tpu.pipeline_mode<synchronous>, transform_indices = @transform_2, window_bounds = array<i64: 512, 128>}, {pipeline_mode = #tpu.pipeline_mode<synchronous>, transform_indices = @transform_3, window_bounds = array<i64: 1, 128>}, {pipeline_mode = #tpu.pipeline_mode<synchronous>, transform_indices = @transform_4, window_bounds = array<i64: 1, 128>}, {pipeline_mode = #tpu.pipeline_mode<synchronous>, transform_indices = @transform_5, window_bounds = array<i64: 1, 128>}, {transform_indices = @transform_6, window_bounds = array<i64: 16, 128>}]} {
    %c0 = arith.constant 0 : index
    %c0_0 = arith.constant 0 : index
    %0 = vector.load %arg1[%c0, %c0_0] : memref<16x512xbf16, #tpu.memory_space<vmem>>, vector<16x512xbf16>
    %c0_1 = arith.constant 0 : index
    %c0_2 = arith.constant 0 : index
    %1 = vector.load %arg3[%c0_1, %c0_2] : memref<512x128xbf16, #tpu.memory_space<vmem>>, vector<512x128xbf16>
    %cst = arith.constant dense<0.000000e+00> : vector<16x128xf32>
    %2 = tpu.matmul %0, %1, %cst {dimension_numbers = #tpu.dot_dimension_numbers<[1], [0], [0], [1], [0, 0, 1, 1], [], []>} : vector<16x512xbf16>, vector<512x128xbf16>, vector<16x128xf32> -> vector<16x128xf32>
    %c0_3 = arith.constant 0 : index
    %c0_4 = arith.constant 0 : index
    %3 = vector.load %arg4[%c0_3, %c0_4] : memref<1x128xf32, #tpu.memory_space<vmem>>, vector<1x128xf32>
    %4 = vector.broadcast %3 : vector<1x128xf32> to vector<16x128xf32>
    %5 = arith.addf %2, %4 : vector<16x128xf32>
    %c0_5 = arith.constant 0 : index
    %c0_6 = arith.constant 0 : index
    %6 = vector.load %arg2[%c0_5, %c0_6] : memref<16x128xf32, #tpu.memory_space<vmem>>, vector<16x128xf32>
    %7 = arith.addf %5, %6 : vector<16x128xf32>
    %cst_7 = arith.constant dense<0.000000e+00> : vector<16xf32>
    %8 = vector.multi_reduction <add>, %7, %cst_7 [1] : vector<16x128xf32> to vector<16xf32>
    %9 = vector.shape_cast %8 : vector<16xf32> to vector<16x1xf32>
    %cst_8 = arith.constant 1.280000e+02 : f32
    %10 = vector.broadcast %cst_8 : f32 to vector<16x1xf32>
    %11 = arith.divf %9, %10 : vector<16x1xf32>
    %12 = vector.broadcast %11 : vector<16x1xf32> to vector<16x128xf32>
    %13 = arith.subf %7, %12 : vector<16x128xf32>
    %14 = arith.mulf %13, %13 : vector<16x128xf32>
    %cst_9 = arith.constant dense<0.000000e+00> : vector<16xf32>
    %15 = vector.multi_reduction <add>, %14, %cst_9 [1] : vector<16x128xf32> to vector<16xf32>
    %16 = vector.shape_cast %15 : vector<16xf32> to vector<16x1xf32>
    %cst_10 = arith.constant 1.280000e+02 : f32
    %17 = vector.broadcast %cst_10 : f32 to vector<16x1xf32>
    %18 = arith.divf %16, %17 : vector<16x1xf32>
    %cst_11 = arith.constant 9.99999996E-13 : f32
    %19 = vector.broadcast %cst_11 : f32 to vector<16x1xf32>
    %20 = arith.addf %18, %19 : vector<16x1xf32>
    %21 = math.rsqrt %20 : vector<16x1xf32>
    %22 = vector.broadcast %21 : vector<16x1xf32> to vector<16x128xf32>
    %23 = arith.mulf %13, %22 : vector<16x128xf32>
    %c0_12 = arith.constant 0 : index
    %c0_13 = arith.constant 0 : index
    %24 = vector.load %arg5[%c0_12, %c0_13] : memref<1x128xf32, #tpu.memory_space<vmem>>, vector<1x128xf32>
    %25 = vector.broadcast %24 : vector<1x128xf32> to vector<16x128xf32>
    %26 = arith.mulf %23, %25 : vector<16x128xf32>
    %c0_14 = arith.constant 0 : index
    %c0_15 = arith.constant 0 : index
    %27 = vector.load %arg6[%c0_14, %c0_15] : memref<1x128xf32, #tpu.memory_space<vmem>>, vector<1x128xf32>
    %28 = vector.broadcast %27 : vector<1x128xf32> to vector<16x128xf32>
    %29 = arith.addf %26, %28 : vector<16x128xf32>
    %c0_16 = arith.constant 0 : index
    %c0_17 = arith.constant 0 : index
    %30 = vector.load %arg7[%c0_16, %c0_17] : memref<16x128xf32, #tpu.memory_space<vmem>>, vector<16x128xf32>
    tpu.vector_store %arg7[%c0_16, %c0_17], %29 {strides = array<i32>} : memref<16x128xf32, #tpu.memory_space<vmem>>, vector<16x128xf32>,
    return
  }
  func.func @transform_0(%arg0: i32) -> (i32, i32) {
    %c0_i32 = arith.constant 0 : i32
    %c0_i32_0 = arith.constant 0 : i32
    return %arg0, %c0_i32 : i32, i32
  }
  func.func @transform_1(%arg0: i32) -> (i32, i32) {
    %c0_i32 = arith.constant 0 : i32
    %c0_i32_0 = arith.constant 0 : i32
    return %arg0, %c0_i32 : i32, i32
  }
  func.func @transform_2(%arg0: i32) -> (i32, i32) {
    %c0_i32 = arith.constant 0 : i32
    %c0_i32_0 = arith.constant 0 : i32
    %c0_i32_1 = arith.constant 0 : i32
    return %c0_i32, %c0_i32_0 : i32, i32
  }
  func.func @transform_3(%arg0: i32) -> (i32, i32) {
    %c0_i32 = arith.constant 0 : i32
    %c0_i32_0 = arith.constant 0 : i32
    %c0_i32_1 = arith.constant 0 : i32
    return %c0_i32, %c0_i32_0 : i32, i32
  }
  func.func @transform_4(%arg0: i32) -> (i32, i32) {
    %c0_i32 = arith.constant 0 : i32
    %c0_i32_0 = arith.constant 0 : i32
    %c0_i32_1 = arith.constant 0 : i32
    return %c0_i32, %c0_i32_0 : i32, i32
  }
  func.func @transform_5(%arg0: i32) -> (i32, i32) {
    %c0_i32 = arith.constant 0 : i32
    %c0_i32_0 = arith.constant 0 : i32
    %c0_i32_1 = arith.constant 0 : i32
    return %c0_i32, %c0_i32_0 : i32, i32
  }
  func.func @transform_6(%arg0: i32) -> (i32, i32) {
    %c0_i32 = arith.constant 0 : i32
    %c0_i32_0 = arith.constant 0 : i32
    return %arg0, %c0_i32 : i32, i32
  }
}

module attributes {stable_mosaic.version = 11 : i64} {
  func.func @bert_output_kernel(%arg0: i32, %arg1: memref<16x512xbf16, #tpu.memory_space<vmem>>, %arg2: memref<16x128xf32, #tpu.memory_space<vmem>>, %arg3: memref<512x128xbf16, #tpu.memory_space<vmem>>, %arg4: memref<1x128xf32, #tpu.memory_space<vmem>>, %arg5: memref<1x128xf32, #tpu.memory_space<vmem>>, %arg6: memref<1x128xf32, #tpu.memory_space<vmem>>, %arg7: memref<16x128xf32, #tpu.memory_space<vmem>>) attributes {dimension_semantics = [#tpu.dimension_semantics<parallel>], iteration_bounds = array<i64: 1>, scalar_prefetch = 0 : i64, scratch_operands = 0 : i64, tpu.core_type = #tpu.core_type<tc>, window_params = [{transform_indices = @transform_0, window_bounds = array<i64: 16, 512>}, {transform_indices = @transform_1, window_bounds = array<i64: 16, 128>}, {pipeline_mode = #tpu.pipeline_mode<synchronous>, transform_indices = @transform_2, window_bounds = array<i64: 512, 128>}, {pipeline_mode = #tpu.pipeline_mode<synchronous>, transform_indices = @transform_3, window_bounds = array<i64: 1, 128>}, {pipeline_mode = #tpu.pipeline_mode<synchronous>, transform_indices = @transform_4, window_bounds = array<i64: 1, 128>}, {pipeline_mode = #tpu.pipeline_mode<synchronous>, transform_indices = @transform_5, window_bounds = array<i64: 1, 128>}, {transform_indices = @transform_6, window_bounds = array<i64: 16, 128>}]} {
    %c0 = arith.constant 0 : index
    %c0_0 = arith.constant 0 : index
    %0 = vector.load %arg1[%c0, %c0_0] : memref<16x512xbf16, #tpu.memory_space<vmem>>, vector<16x512xbf16>
    %c0_1 = arith.constant 0 : index
    %c0_2 = arith.constant 0 : index
    %1 = vector.load %arg3[%c0_1, %c0_2] : memref<512x128xbf16, #tpu.memory_space<vmem>>, vector<512x128xbf16>
    %cst = arith.constant dense<0.000000e+00> : vector<16x128xf32>
    %2 = tpu.matmul %0, %1, %cst {dimension_numbers = #tpu.dot_dimension_numbers<[1], [0], [0], [1], [0, 0, 1, 1], [], []>} : vector<16x512xbf16>, vector<512x128xbf16>, vector<16x128xf32> -> vector<16x128xf32>
    %c0_3 = arith.constant 0 : index
    %c0_4 = arith.constant 0 : index
    %3 = vector.load %arg4[%c0_3, %c0_4] : memref<1x128xf32, #tpu.memory_space<vmem>>, vector<1x128xf32>
    %4 = vector.broadcast %3 : vector<1x128xf32> to vector<16x128xf32>
    %5 = arith.addf %2, %4 : vector<16x128xf32>
    %c0_5 = arith.constant 0 : index
    %c0_6 = arith.constant 0 : index
    %6 = vector.load %arg2[%c0_5, %c0_6] : memref<16x128xf32, #tpu.memory_space<vmem>>, vector<16x128xf32>
    %7 = arith.addf %5, %6 : vector<16x128xf32>
    %cst_7 = arith.constant dense<0.000000e+00> : vector<16xf32>
    %8 = vector.multi_reduction <add>, %7, %cst_7 [1] : vector<16x128xf32> to vector<16xf32>
    %9 = vector.shape_cast %8 : vector<16xf32> to vector<16x1xf32>
    %cst_8 = arith.constant 1.280000e+02 : f32
    %10 = vector.broadcast %cst_8 : f32 to vector<16x1xf32>
    %11 = arith.divf %9, %10 : vector<16x1xf32>
    %12 = vector.broadcast %11 : vector<16x1xf32> to vector<16x128xf32>
    %13 = arith.subf %7, %12 : vector<16x128xf32>
    %14 = arith.mulf %13, %13 : vector<16x128xf32>
    %cst_9 = arith.constant dense<0.000000e+00> : vector<16xf32>
    %15 = vector.multi_reduction <add>, %14, %cst_9 [1] : vector<16x128xf32> to vector<16xf32>
    %16 = vector.shape_cast %15 : vector<16xf32> to vector<16x1xf32>
    %cst_10 = arith.constant 1.280000e+02 : f32
    %17 = vector.broadcast %cst_10 : f32 to vector<16x1xf32>
    %18 = arith.divf %16, %17 : vector<16x1xf32>
    %cst_11 = arith.constant 9.99999996E-13 : f32
    %19 = vector.broadcast %cst_11 : f32 to vector<16x1xf32>
    %20 = arith.addf %18, %19 : vector<16x1xf32>
    %21 = math.rsqrt %20 : vector<16x1xf32>
    %22 = vector.broadcast %21 : vector<16x1xf32> to vector<16x128xf32>
    %23 = arith.mulf %13, %22 : vector<16x128xf32>
    %c0_12 = arith.constant 0 : index
    %c0_13 = arith.constant 0 : index
    %24 = vector.load %arg5[%c0_12, %c0_13] : memref<1x128xf32, #tpu.memory_space<vmem>>, vector<1x128xf32>
    %25 = vector.broadcast %24 : vector<1x128xf32> to vector<16x128xf32>
    %26 = arith.mulf %23, %25 : vector<16x128xf32>
    %c0_14 = arith.constant 0 : index
    %c0_15 = arith.constant 0 : index
    %27 = vector.load %arg6[%c0_14, %c0_15] : memref<1x128xf32, #tpu.memory_space<vmem>>, vector<1x128xf32>
    %28 = vector.broadcast %27 : vector<1x128xf32> to vector<16x128xf32>
    %29 = arith.addf %26, %28 : vector<16x128xf32>
    %c0_16 = arith.constant 0 : index
    %c0_17 = arith.constant 0 : index
    %30 = vector.load %arg7[%c0_16, %c0_17] : memref<16x128xf32, #tpu.memory_space<vmem>>, vector<16x128xf32>
    tpu.vector_store %arg7[%c0_16, %c0_17], %29 {strides = array<i32>} : memref<16x128xf32, #tpu.memory_space<vmem>>, vector<16x128xf32>,
    return
  }
  func.func @transform_0(%arg0: i32) -> (i32, i32) {
    %c0_i32 = arith.constant 0 : i32
    %c0_i32_0 = arith.constant 0 : i32
    return %arg0, %c0_i32 : i32, i32
  }
  func.func @transform_1(%arg0: i32) -> (i32, i32) {
    %c0_i32 = arith.constant 0 : i32
    %c0_i32_0 = arith.constant 0 : i32
    return %arg0, %c0_i32 : i32, i32
  }
  func.func @transform_2(%arg0: i32) -> (i32, i32) {
    %c0_i32 = arith.constant 0 : i32
    %c0_i32_0 = arith.constant 0 : i32
    %c0_i32_1 = arith.constant 0 : i32
    return %c0_i32, %c0_i32_0 : i32, i32
  }
  func.func @transform_3(%arg0: i32) -> (i32, i32) {
    %c0_i32 = arith.constant 0 : i32
    %c0_i32_0 = arith.constant 0 : i32
    %c0_i32_1 = arith.constant 0 : i32
    return %c0_i32, %c0_i32_0 : i32, i32
  }
  func.func @transform_4(%arg0: i32) -> (i32, i32) {
    %c0_i32 = arith.constant 0 : i32
    %c0_i32_0 = arith.constant 0 : i32
    %c0_i32_1 = arith.constant 0 : i32
    return %c0_i32, %c0_i32_0 : i32, i32
  }
  func.func @transform_5(%arg0: i32) -> (i32, i32) {
    %c0_i32 = arith.constant 0 : i32
    %c0_i32_0 = arith.constant 0 : i32
    %c0_i32_1 = arith.constant 0 : i32
    return %c0_i32, %c0_i32_0 : i32, i32
  }
  func.func @transform_6(%arg0: i32) -> (i32, i32) {
    %c0_i32 = arith.constant 0 : i32
    %c0_i32_0 = arith.constant 0 : i32
    return %arg0, %c0_i32 : i32, i32
  }
}

</mosaic_0001>

<bundles_post_ra>
// kernel: _bert_output_impl.1
= control target key start
LH: loop header
LB: loop body
LE: loop exit
PB: predicated region body
PF: predicated region fallthrough
CT: control target
= control target key end

     0   :  { %s771_s0 = inlined_call_operand.vmem [shape: bf16[16,512], index: 0, kind: input, shape index: {}]   ;;  %s772_s1 = inlined_call_operand.vmem [shape: f32[16,128], index: 1, kind: input, shape index: {}]   ;;  %s773_s2 = inlined_call_operand.vmem [shape: bf16[512,128], index: 2, kind: input, shape index: {}]   ;;  %s774_s3 = inlined_call_operand.vmem [shape: f32[1,128], index: 3, kind: input, shape index: {}]   ;;  %s775_s4 = inlined_call_operand.vmem [shape: f32[1,128], index: 4, kind: input, shape index: {}]   ;;  %s776_s5 = inlined_call_operand.vmem [shape: f32[1,128], index: 5, kind: input, shape index: {}]   ;;  %s777_s6 = inlined_call_operand.hbm [shape: f32[16,128], index: 6, kind: output, shape index: {}]  }
   0x1   :  { %v543_v0 = vld [vmem:[%s773_s2 + $0x78] sm:$0xff]   ;;  %v547_v4 = vld [vmem:[%s773_s2 + $0x70] sm:$0xff]   ;;  %v551_v8 = vld [vmem:[%s773_s2 + $0x68] sm:$0xff]  }
   0x2   :  { %v544_v1 = vld [vmem:[%s773_s2 + $0xf8] sm:$0xff]   ;;  %496 = vmatprep.subr.bf16.mxu0 %v543_v0  ;;  %v548_v5 = vld [vmem:[%s773_s2 + $0xf0] sm:$0xff]   ;;  %v552_v9 = vld [vmem:[%s773_s2 + $0xe8] sm:$0xff]  }
   0x3   :  { %v545_v2 = vld [vmem:[%s773_s2 + $0x38] sm:$0xff]   ;;  %518 = vmatprep.subr.bf16.mxu1 %v544_v1  ;;  %v549_v6 = vld [vmem:[%s773_s2 + $0x30] sm:$0xff]   ;;  %v553_v10 = vld [vmem:[%s773_s2 + $0x28] sm:$0xff]  }
   0x4   :  { %v546_v3 = vld [vmem:[%s773_s2 + $0xb8] sm:$0xff]   ;;  %497 = vmatpush3.bf16.msra.mxu0 %v545_v2  ;;  %v550_v7 = vld [vmem:[%s773_s2 + $0xb0] sm:$0xff]   ;;  %v554_v11 = vld [vmem:[%s773_s2 + $0xa8] sm:$0xff]  }
   0x5   :  { %519 = vmatpush3.bf16.msra.mxu1 %v546_v3  ;;  %498 = vmatprep.subr.bf16.mxu0 %v547_v4  ;;  %v555_v12 = vld [vmem:[%s773_s2 + $0x60] sm:$0xff]   ;;  %v559_v16 = vld [vmem:[%s773_s2 + $0x58] sm:$0xff]   ;;  %v563_v20 = vld [vmem:[%s773_s2 + $0x50] sm:$0xff]  }
   0x6   :  { %520 = vmatprep.subr.bf16.mxu1 %v548_v5  ;;  %v556_v13 = vld [vmem:[%s773_s2 + $0xe0] sm:$0xff]   ;;  %v560_v17 = vld [vmem:[%s773_s2 + $0xd8] sm:$0xff]   ;;  %v564_v21 = vld [vmem:[%s773_s2 + $0xd0] sm:$0xff]  }
   0x7   :  { %v557_v14 = vld [vmem:[%s773_s2 + $0x20] sm:$0xff]   ;;  %v561_v18 = vld [vmem:[%s773_s2 + $0x18] sm:$0xff]   ;;  %v565_v22 = vld [vmem:[%s773_s2 + $0x10] sm:$0xff]  }
   0x8   :  { %499 = vmatpush3.bf16.msra.mxu0 %v549_v6  ;;  %v558_v15 = vld [vmem:[%s773_s2 + $0xa0] sm:$0xff]   ;;  %v562_v19 = vld [vmem:[%s773_s2 + $0x98] sm:$0xff]   ;;  %v566_v23 = vld [vmem:[%s773_s2 + $0x90] sm:$0xff]  }
   0x9   :  { %521 = vmatpush3.bf16.msra.mxu1 %v550_v7  ;;  %500 = vmatprep.subr.bf16.mxu0 %v551_v8  ;;  %v567_v24 = vld [vmem:[%s773_s2 + $0x48] sm:$0xff]   ;;  %v571_v28 = vld [vmem:[%s773_s2 + $0x40] sm:$0xff]  }
   0xa   :  { %522 = vmatprep.subr.bf16.mxu1 %v552_v9  ;;  %v568_v25 = vld [vmem:[%s773_s2 + $0xc8] sm:$0xff]   ;;  %v572_v29 = vld [vmem:[%s773_s2 + $0xc0] sm:$0xff]  }
   0xb   :  { %v569_v26 = vld [vmem:[%s773_s2 + $0x8] sm:$0xff]   ;;  %v573_v30 = vld [vmem:[%s773_s2] sm:$0xff]  }
   0xc   :  { %501 = vmatpush3.bf16.msra.mxu0 %v553_v10  ;;  %v570_v27 = vld [vmem:[%s773_s2 + $0x88] sm:$0xff]   ;;  %v574_v31 = vld [vmem:[%s773_s2 + $0x80] sm:$0xff]  }
   0xd   :  { %523 = vmatpush3.bf16.msra.mxu1 %v554_v11  ;;  %502 = vmatprep.subr.bf16.mxu0 %v555_v12  ;;  %v575_v32 = vld [vmem:[%s771_s0] ss:$16 sps:$4 sm:$0xff]   ;;  %v577_v33 = vld [vmem:[%s771_s0 + $0x4] ss:$16 sps:$4 sm:$0xff]   ;;  %v578_v34 = vld [vmem:[%s771_s0 + $0x8] ss:$16 sps:$4 sm:$0xff]  }
   0xe   :  { %524 = vmatprep.subr.bf16.mxu1 %v556_v13  ;;  %v580_v35 = vld [vmem:[%s771_s0 + $0xc] ss:$16 sps:$4 sm:$0xff]  }
  0x10   :  { %503 = vmatpush3.bf16.msra.mxu0 %v557_v14 }
  0x11   :  { %525 = vmatpush3.bf16.msra.mxu1 %v558_v15  ;;  %504 = vmatprep.subr.bf16.mxu0 %v559_v16 }
  0x12   :  { %526 = vmatprep.subr.bf16.mxu1 %v560_v17 }
  0x14   :  { %505 = vmatpush3.bf16.msra.mxu0 %v561_v18 }
  0x15   :  { %527 = vmatpush3.bf16.msra.mxu1 %v562_v19  ;;  %506 = vmatprep.subr.bf16.mxu0 %v563_v20 }
  0x16   :  { %528 = vmatprep.subr.bf16.mxu1 %v564_v21 }
  0x18   :  { %507 = vmatpush3.bf16.msra.mxu0 %v565_v22 }
  0x19   :  { %529 = vmatpush3.bf16.msra.mxu1 %v566_v23  ;;  %508 = vmatprep.subr.bf16.mxu0 %v567_v24 }
  0x1a   :  { %530 = vmatprep.subr.bf16.mxu1 %v568_v25 }
  0x1c   :  { %509 = vmatpush3.bf16.msra.mxu0 %v569_v26 }
  0x1d   :  { %531 = vmatpush3.bf16.msra.mxu1 %v570_v27  ;;  %510 = vmatprep.subr.bf16.mxu0 %v571_v28 }
  0x1e   :  { %532 = vmatprep.subr.bf16.mxu1 %v572_v29 }
  0x20   :  { %511 = vmatpush3.bf16.msra.mxu0 %v573_v30 }
  0x21   :  { %533 = vmatpush3.bf16.msra.mxu1 %v574_v31 }
  0x22   :  { %11 = vsyncpa [#allocation3], 0  ;;  %344 = vmatprep.mubr.bf16.mxu0 %v577_v33  ;;  %385 = vmatprep.mubr.bf16.mxu1 %v580_v35  ;;  %v457_v38 = vld [vmem:[%s774_s3] ss:$0 sm:$0xff]  ;;  %v395_v54 = vld [vmem:[%s772_s1 + $0x8] sm:$0xff]  ;;  %s607_s27 = smov [#allocation2]  }
  0x23   :  { %345 = vmatmul.mubr.bf16.vlgmr.msra.gmra.mxu0 %v575_v32  ;;  %v394_v47 = vld [vmem:[%s772_s1] sm:$0xff]  ;;  %s446_s28 = sshll.u32 %s607_s27, 4  ;;  %s447_s28 = int_to_ptr.vmem [resolvable:$true] %s446_s28 }
  0x24   :  { %386 = vmatmul.mubr.bf16.vlgmr.msra.gmra.mxu1 %v578_v34  ;;  %v494_v8 = vld [vmem:[%s775_s4] ss:$0 sm:$0xff]  ;;  %s585_s29 = scalar_lea.vmem %s447_s28, 256  ;;  %p590_p1 = scmp.lt.s32.totalorder %s447_s28, %s447_s28 }
  0x25   :  { %v495_v10 = vld [vmem:[%s776_s5] ss:$0 sm:$0xff]  ;;  %p586_p0 = scmp.ne.s32.totalorder %s447_s28, %s585_s29  ;;  %p591_p2 = scmp.lt.s32.totalorder %s585_s29, %s585_s29 }
  0x27   :  { %p592_p3 = por %p591_p2, %p590_p1 }
  0x29   :  { %p593_p4 = pnand %p592_p3, %p586_p0 }
  0xe3   :  { %v512_v36 = vpop.f32.mrf.mxu0 }
  0xe4   :  { %v534_v37 = vpop.f32.mrf.mxu1 }
  0xe5   :  { %v513_v39 = vpop.f32.mrf.mxu0 }
  0xe6   :  { %v514_v40 = vadd.f32 %v513_v39, %v512_v36  ;;  %v535_v41 = vpop.f32.mrf.mxu1 }
  0xe7   :  { %v515_v42 = vpop.f32.mrf.mxu0  ;;  %v536_v44 = vadd.f32 %v535_v41, %v534_v37 }
  0xe8   :  { %v347_v43 = vadd.f32 %v514_v40, %v457_v38  ;;  %v537_v45 = vpop.f32.mrf.mxu1 }
  0xe9   :  { %v516_v46 = vpop.f32.mrf.mxu0 }
  0xea   :  { %v388_v48 = vadd.f32 %v536_v44, %v347_v43  ;;  %v517_v49 = vadd.f32 %v516_v46, %v515_v42  ;;  %v538_v50 = vpop.f32.mrf.mxu1 }
  0xeb   :  { %v539_v52 = vadd.f32 %v538_v50, %v537_v45 }
  0xec   :  { %v350_v51 = vadd.f32 %v517_v49, %v457_v38  ;;  %v396_v53 = vadd.f32 %v394_v47, %v388_v48 }
  0xee   :  { %v391_v55 = vadd.f32 %v539_v52, %v350_v51  ;;  %398 = vadd.xlane.f32.xlu0 %v396_v53 }
  0xf0   :  { %v397_v56 = vadd.f32 %v395_v54, %v391_v55 }
  0xf2   :  { %400 = vadd.xlane.f32.xlu0 %v397_v56 }
 0x177   :  { %v399_v57 = vpop.xlane.xlu0 %398 }
 0x178   :  { %v403_v58 = vmul.f32 0.0078125, %v399_v57 }
 0x17a   :  { %v405_v59 = vsub.f32 %v396_v53, %v403_v58 }
 0x17b   :  { %v401_v60 = vpop.xlane.xlu0 %400 }
 0x17c   :  { %v404_v61 = vmul.f32 0.0078125, %v401_v60  ;;  %v407_v62 = vmul.f32 %v405_v59, %v405_v59 }
 0x17e   :  { %v406_v63 = vsub.f32 %v397_v56, %v404_v61  ;;  %409 = vadd.xlane.f32.xlu1 %v407_v62 }
 0x180   :  { %v408_v0 = vmul.f32 %v406_v63, %v406_v63 }
 0x182   :  { %411 = vadd.xlane.f32.xlu1 %v408_v0 }
 0x207   :  { %v410_v1 = vpop.xlane.xlu1 %409 }
 0x208   :  { %v413_v2 = vmul.f32 0.0078125, %v410_v1 }
 0x20a   :  { %v415_v3 = vadd.f32 1e-12, %v413_v2 }
 0x20b   :  { %v412_v4 = vpop.xlane.xlu1 %411 }
 0x20c   :  { %581 = vrsqrt.f32 %v415_v3  ;;  %v414_v5 = vmul.f32 0.0078125, %v412_v4 }
 0x20e   :  { %v416_v6 = vadd.f32 1e-12, %v414_v5 }
 0x210   :  { %583 = vrsqrt.f32 %v416_v6 }
 0x219   :  { %v582_v7 = vpop.eup %581 }
 0x21a   :  { %v419_v9 = vmul.f32 %v582_v7, %v405_v59 }
 0x21c   :  { %v428_v11 = vmul.f32 %v494_v8, %v419_v9 }
 0x21d   :  { %v584_v12 = vpop.eup %583 }
 0x21e   :  { %v420_v13 = vmul.f32 %v584_v12, %v406_v63  ;;  %v437_v14 = vadd.f32 %v495_v10, %v428_v11 }
 0x220   :  { %v429_v15 = vmul.f32 %v494_v8, %v420_v13  ;;  %439 = vst [vmem:[#allocation2] sm:$0xff] %v437_v14 }
 0x222   :  { %v438_v16 = vadd.f32 %v495_v10, %v429_v15 }
 0x224   :  { %440 = vst [vmem:[#allocation2 + $0x8] sm:$0xff] %v438_v16 }
 0x225   :  { %596 = shalt.err (!%p593_p4)
}
 0x226   :  { %s608_s4 = smov 128   ;;  %s609_s5 = smov 8  }
 0x227   :  { %452 = dma.vmem_to_hbm [thread:$0]  %s447_s28, 256, %s777_s6, [#allocation3], %s608_s4, %s608_s4, %s609_s5  }
 0x228   :  { %605 = dma.done.wait [#allocation3], 256  }
 0x229   :  { %606 = vsyncadd [#allocation3], 4294967040 }
 0x22a   :  { %456 = vsyncpa [#allocation3], 1 }

// kernel: _bert_output_impl.1
= control target key start
LH: loop header
LB: loop body
LE: loop exit
PB: predicated region body
PF: predicated region fallthrough
CT: control target
= control target key end

     0   :  { %s771_s0 = inlined_call_operand.vmem [shape: bf16[16,512], index: 0, kind: input, shape index: {}]   ;;  %s772_s1 = inlined_call_operand.vmem [shape: f32[16,128], index: 1, kind: input, shape index: {}]   ;;  %s773_s2 = inlined_call_operand.vmem [shape: bf16[512,128], index: 2, kind: input, shape index: {}]   ;;  %s774_s3 = inlined_call_operand.vmem [shape: f32[1,128], index: 3, kind: input, shape index: {}]   ;;  %s775_s4 = inlined_call_operand.vmem [shape: f32[1,128], index: 4, kind: input, shape index: {}]   ;;  %s776_s5 = inlined_call_operand.vmem [shape: f32[1,128], index: 5, kind: input, shape index: {}]   ;;  %s777_s6 = inlined_call_operand.hbm [shape: f32[16,128], index: 6, kind: output, shape index: {}]  }
   0x1   :  { %v543_v0 = vld [vmem:[%s773_s2 + $0x78] sm:$0xff]   ;;  %v547_v4 = vld [vmem:[%s773_s2 + $0x70] sm:$0xff]   ;;  %v551_v8 = vld [vmem:[%s773_s2 + $0x68] sm:$0xff]  }
   0x2   :  { %v544_v1 = vld [vmem:[%s773_s2 + $0xf8] sm:$0xff]   ;;  %496 = vmatprep.subr.bf16.mxu0 %v543_v0  ;;  %v548_v5 = vld [vmem:[%s773_s2 + $0xf0] sm:$0xff]   ;;  %v552_v9 = vld [vmem:[%s773_s2 + $0xe8] sm:$0xff]  }
   0x3   :  { %v545_v2 = vld [vmem:[%s773_s2 + $0x38] sm:$0xff]   ;;  %518 = vmatprep.subr.bf16.mxu1 %v544_v1  ;;  %v549_v6 = vld [vmem:[%s773_s2 + $0x30] sm:$0xff]   ;;  %v553_v10 = vld [vmem:[%s773_s2 + $0x28] sm:$0xff]  }
   0x4   :  { %v546_v3 = vld [vmem:[%s773_s2 + $0xb8] sm:$0xff]   ;;  %497 = vmatpush3.bf16.msra.mxu0 %v545_v2  ;;  %v550_v7 = vld [vmem:[%s773_s2 + $0xb0] sm:$0xff]   ;;  %v554_v11 = vld [vmem:[%s773_s2 + $0xa8] sm:$0xff]  }
   0x5   :  { %519 = vmatpush3.bf16.msra.mxu1 %v546_v3  ;;  %498 = vmatprep.subr.bf16.mxu0 %v547_v4  ;;  %v555_v12 = vld [vmem:[%s773_s2 + $0x60] sm:$0xff]   ;;  %v559_v16 = vld [vmem:[%s773_s2 + $0x58] sm:$0xff]   ;;  %v563_v20 = vld [vmem:[%s773_s2 + $0x50] sm:$0xff]  }
   0x6   :  { %520 = vmatprep.subr.bf16.mxu1 %v548_v5  ;;  %v556_v13 = vld [vmem:[%s773_s2 + $0xe0] sm:$0xff]   ;;  %v560_v17 = vld [vmem:[%s773_s2 + $0xd8] sm:$0xff]   ;;  %v564_v21 = vld [vmem:[%s773_s2 + $0xd0] sm:$0xff]  }
   0x7   :  { %v557_v14 = vld [vmem:[%s773_s2 + $0x20] sm:$0xff]   ;;  %v561_v18 = vld [vmem:[%s773_s2 + $0x18] sm:$0xff]   ;;  %v565_v22 = vld [vmem:[%s773_s2 + $0x10] sm:$0xff]  }
   0x8   :  { %499 = vmatpush3.bf16.msra.mxu0 %v549_v6  ;;  %v558_v15 = vld [vmem:[%s773_s2 + $0xa0] sm:$0xff]   ;;  %v562_v19 = vld [vmem:[%s773_s2 + $0x98] sm:$0xff]   ;;  %v566_v23 = vld [vmem:[%s773_s2 + $0x90] sm:$0xff]  }
   0x9   :  { %521 = vmatpush3.bf16.msra.mxu1 %v550_v7  ;;  %500 = vmatprep.subr.bf16.mxu0 %v551_v8  ;;  %v567_v24 = vld [vmem:[%s773_s2 + $0x48] sm:$0xff]   ;;  %v571_v28 = vld [vmem:[%s773_s2 + $0x40] sm:$0xff]  }
   0xa   :  { %522 = vmatprep.subr.bf16.mxu1 %v552_v9  ;;  %v568_v25 = vld [vmem:[%s773_s2 + $0xc8] sm:$0xff]   ;;  %v572_v29 = vld [vmem:[%s773_s2 + $0xc0] sm:$0xff]  }
   0xb   :  { %v569_v26 = vld [vmem:[%s773_s2 + $0x8] sm:$0xff]   ;;  %v573_v30 = vld [vmem:[%s773_s2] sm:$0xff]  }
   0xc   :  { %501 = vmatpush3.bf16.msra.mxu0 %v553_v10  ;;  %v570_v27 = vld [vmem:[%s773_s2 + $0x88] sm:$0xff]   ;;  %v574_v31 = vld [vmem:[%s773_s2 + $0x80] sm:$0xff]  }
   0xd   :  { %523 = vmatpush3.bf16.msra.mxu1 %v554_v11  ;;  %502 = vmatprep.subr.bf16.mxu0 %v555_v12  ;;  %v575_v32 = vld [vmem:[%s771_s0] ss:$16 sps:$4 sm:$0xff]   ;;  %v577_v33 = vld [vmem:[%s771_s0 + $0x4] ss:$16 sps:$4 sm:$0xff]   ;;  %v578_v34 = vld [vmem:[%s771_s0 + $0x8] ss:$16 sps:$4 sm:$0xff]  }
   0xe   :  { %524 = vmatprep.subr.bf16.mxu1 %v556_v13  ;;  %v580_v35 = vld [vmem:[%s771_s0 + $0xc] ss:$16 sps:$4 sm:$0xff]  }
  0x10   :  { %503 = vmatpush3.bf16.msra.mxu0 %v557_v14 }
  0x11   :  { %525 = vmatpush3.bf16.msra.mxu1 %v558_v15  ;;  %504 = vmatprep.subr.bf16.mxu0 %v559_v16 }
  0x12   :  { %526 = vmatprep.subr.bf16.mxu1 %v560_v17 }
  0x14   :  { %505 = vmatpush3.bf16.msra.mxu0 %v561_v18 }
  0x15   :  { %527 = vmatpush3.bf16.msra.mxu1 %v562_v19  ;;  %506 = vmatprep.subr.bf16.mxu0 %v563_v20 }
  0x16   :  { %528 = vmatprep.subr.bf16.mxu1 %v564_v21 }
  0x18   :  { %507 = vmatpush3.bf16.msra.mxu0 %v565_v22 }
  0x19   :  { %529 = vmatpush3.bf16.msra.mxu1 %v566_v23  ;;  %508 = vmatprep.subr.bf16.mxu0 %v567_v24 }
  0x1a   :  { %530 = vmatprep.subr.bf16.mxu1 %v568_v25 }
  0x1c   :  { %509 = vmatpush3.bf16.msra.mxu0 %v569_v26 }
  0x1d   :  { %531 = vmatpush3.bf16.msra.mxu1 %v570_v27  ;;  %510 = vmatprep.subr.bf16.mxu0 %v571_v28 }
  0x1e   :  { %532 = vmatprep.subr.bf16.mxu1 %v572_v29 }
  0x20   :  { %511 = vmatpush3.bf16.msra.mxu0 %v573_v30 }
  0x21   :  { %533 = vmatpush3.bf16.msra.mxu1 %v574_v31 }
  0x22   :  { %11 = vsyncpa [#allocation3], 0  ;;  %344 = vmatprep.mubr.bf16.mxu0 %v577_v33  ;;  %385 = vmatprep.mubr.bf16.mxu1 %v580_v35  ;;  %v457_v38 = vld [vmem:[%s774_s3] ss:$0 sm:$0xff]  ;;  %v395_v54 = vld [vmem:[%s772_s1 + $0x8] sm:$0xff]  ;;  %s607_s27 = smov [#allocation2]  }
  0x23   :  { %345 = vmatmul.mubr.bf16.vlgmr.msra.gmra.mxu0 %v575_v32  ;;  %v394_v47 = vld [vmem:[%s772_s1] sm:$0xff]  ;;  %s446_s28 = sshll.u32 %s607_s27, 4  ;;  %s447_s28 = int_to_ptr.vmem [resolvable:$true] %s446_s28 }
  0x24   :  { %386 = vmatmul.mubr.bf16.vlgmr.msra.gmra.mxu1 %v578_v34  ;;  %v494_v8 = vld [vmem:[%s775_s4] ss:$0 sm:$0xff]  ;;  %s585_s29 = scalar_lea.vmem %s447_s28, 256  ;;  %p590_p1 = scmp.lt.s32.totalorder %s447_s28, %s447_s28 }
  0x25   :  { %v495_v10 = vld [vmem:[%s776_s5] ss:$0 sm:$0xff]  ;;  %p586_p0 = scmp.ne.s32.totalorder %s447_s28, %s585_s29  ;;  %p591_p2 = scmp.lt.s32.totalorder %s585_s29, %s585_s29 }
  0x27   :  { %p592_p3 = por %p591_p2, %p590_p1 }
  0x29   :  { %p593_p4 = pnand %p592_p3, %p586_p0 }
  0xe3   :  { %v512_v36 = vpop.f32.mrf.mxu0 }
  0xe4   :  { %v534_v37 = vpop.f32.mrf.mxu1 }
  0xe5   :  { %v513_v39 = vpop.f32.mrf.mxu0 }
  0xe6   :  { %v514_v40 = vadd.f32 %v513_v39, %v512_v36  ;;  %v535_v41 = vpop.f32.mrf.mxu1 }
  0xe7   :  { %v515_v42 = vpop.f32.mrf.mxu0  ;;  %v536_v44 = vadd.f32 %v535_v41, %v534_v37 }
  0xe8   :  { %v347_v43 = vadd.f32 %v514_v40, %v457_v38  ;;  %v537_v45 = vpop.f32.mrf.mxu1 }
  0xe9   :  { %v516_v46 = vpop.f32.mrf.mxu0 }
  0xea   :  { %v388_v48 = vadd.f32 %v536_v44, %v347_v43  ;;  %v517_v49 = vadd.f32 %v516_v46, %v515_v42  ;;  %v538_v50 = vpop.f32.mrf.mxu1 }
  0xeb   :  { %v539_v52 = vadd.f32 %v538_v50, %v537_v45 }
  0xec   :  { %v350_v51 = vadd.f32 %v517_v49, %v457_v38  ;;  %v396_v53 = vadd.f32 %v394_v47, %v388_v48 }
  0xee   :  { %v391_v55 = vadd.f32 %v539_v52, %v350_v51  ;;  %398 = vadd.xlane.f32.xlu0 %v396_v53 }
  0xf0   :  { %v397_v56 = vadd.f32 %v395_v54, %v391_v55 }
  0xf2   :  { %400 = vadd.xlane.f32.xlu0 %v397_v56 }
 0x177   :  { %v399_v57 = vpop.xlane.xlu0 %398 }
 0x178   :  { %v403_v58 = vmul.f32 0.0078125, %v399_v57 }
 0x17a   :  { %v405_v59 = vsub.f32 %v396_v53, %v403_v58 }
 0x17b   :  { %v401_v60 = vpop.xlane.xlu0 %400 }
 0x17c   :  { %v404_v61 = vmul.f32 0.0078125, %v401_v60  ;;  %v407_v62 = vmul.f32 %v405_v59, %v405_v59 }
 0x17e   :  { %v406_v63 = vsub.f32 %v397_v56, %v404_v61  ;;  %409 = vadd.xlane.f32.xlu1 %v407_v62 }
 0x180   :  { %v408_v0 = vmul.f32 %v406_v63, %v406_v63 }
 0x182   :  { %411 = vadd.xlane.f32.xlu1 %v408_v0 }
 0x207   :  { %v410_v1 = vpop.xlane.xlu1 %409 }
 0x208   :  { %v413_v2 = vmul.f32 0.0078125, %v410_v1 }
 0x20a   :  { %v415_v3 = vadd.f32 1e-12, %v413_v2 }
 0x20b   :  { %v412_v4 = vpop.xlane.xlu1 %411 }
 0x20c   :  { %581 = vrsqrt.f32 %v415_v3  ;;  %v414_v5 = vmul.f32 0.0078125, %v412_v4 }
 0x20e   :  { %v416_v6 = vadd.f32 1e-12, %v414_v5 }
 0x210   :  { %583 = vrsqrt.f32 %v416_v6 }
 0x219   :  { %v582_v7 = vpop.eup %581 }
 0x21a   :  { %v419_v9 = vmul.f32 %v582_v7, %v405_v59 }
 0x21c   :  { %v428_v11 = vmul.f32 %v494_v8, %v419_v9 }
 0x21d   :  { %v584_v12 = vpop.eup %583 }
 0x21e   :  { %v420_v13 = vmul.f32 %v584_v12, %v406_v63  ;;  %v437_v14 = vadd.f32 %v495_v10, %v428_v11 }
 0x220   :  { %v429_v15 = vmul.f32 %v494_v8, %v420_v13  ;;  %439 = vst [vmem:[#allocation2] sm:$0xff] %v437_v14 }
 0x222   :  { %v438_v16 = vadd.f32 %v495_v10, %v429_v15 }
 0x224   :  { %440 = vst [vmem:[#allocation2 + $0x8] sm:$0xff] %v438_v16 }
 0x225   :  { %596 = shalt.err (!%p593_p4)
}
 0x226   :  { %s608_s4 = smov 128   ;;  %s609_s5 = smov 8  }
 0x227   :  { %452 = dma.vmem_to_hbm [thread:$0]  %s447_s28, 256, %s777_s6, [#allocation3], %s608_s4, %s608_s4, %s609_s5  }
 0x228   :  { %605 = dma.done.wait [#allocation3], 256  }
 0x229   :  { %606 = vsyncadd [#allocation3], 4294967040 }
 0x22a   :  { %456 = vsyncpa [#allocation3], 1 }

</bundles_post_ra>
